<compile_context>
chip_gen: v6e
topology: v6e:2x2x1
jax: 0.10.0
libtpu: 0.0.40
codegen_flags: <defaults>
</compile_context>

<pallas_src>
import functools

import jax
import jax.numpy as jnp
from jax.experimental import pallas as pl
from jax.experimental.pallas import tpu as pltpu


# ----------------------------------------------------------------------------
# Pallas kernels
# ----------------------------------------------------------------------------
def _conv1x1a_kernel(x_ref, w_ref, b_ref, o_ref):
    """Stage 1: conv1 = ReLU(x @ W1_folded + shift).  f32 out (gather-friendly)."""
    y = jnp.dot(x_ref[...], w_ref[...], preferred_element_type=jnp.float32)
    o_ref[...] = jnp.maximum(y + b_ref[...], 0.0)


def _tail_math(yg_bf, x, wg, bg, tw, tb, proj):
    """graphconv+BN+ReLU -> conv1x1b(+shortcut)+BN -> +residual -> ReLU."""
    conv2 = jnp.dot(yg_bf, wg, preferred_element_type=jnp.float32)
    conv2 = jnp.maximum(conv2 + bg, 0.0).astype(jnp.bfloat16)
    if proj:
        # conv1x1b and the projection shortcut share one MXU pass:
        #   [conv2 | x_bf16] @ [wb ; wc]  (+ folded bias bb+bc)
        y = jnp.dot(jnp.concatenate([conv2, x], axis=-1), tw,
                    preferred_element_type=jnp.float32) + tb
    else:
        y = jnp.dot(conv2, tw, preferred_element_type=jnp.float32) + tb + x
    return jnp.maximum(y, 0.0)


def _tail_fused_kernel(neigh_ref, conv1_ref, x_ref, wg_ref, bg_ref,
                       tw_ref, tb_ref, o_ref, *, proj):
    """In-kernel neighbor gather (conv1 fully VMEM-resident) + fused tail."""
    tn, K = neigh_ref.shape
    cb = conv1_ref.shape[1]
    idx = neigh_ref[...]                               # (tn, K) int32, -1 = pad
    valid = idx >= 0
    idx = jnp.where(valid, idx, 0).reshape(tn * K)     # clamp pad slots to row 0
    g = jnp.take(conv1_ref[...], idx, axis=0, mode="promise_in_bounds")
    g = jnp.where(valid.reshape(tn * K, 1), g, 0.0)    # zero out padded slots
    yg = g.reshape(tn, K * cb).astype(jnp.bfloat16)    # (tn, K*cb) bf16
    o_ref[...] = _tail_math(yg, x_ref[...], wg_ref[...], bg_ref[...],
                            tw_ref[...], tb_ref[...], proj)


def _tail_pregathered_kernel(yg_ref, x_ref, wg_ref, bg_ref, tw_ref, tb_ref,
                             o_ref, *, proj):
    """Fallback tail when the neighbor gather is done by XLA outside the kernel."""
    o_ref[...] = _tail_math(yg_ref[...], x_ref[...], wg_ref[...], bg_ref[...],
                            tw_ref[...], tb_ref[...], proj)


# ----------------------------------------------------------------------------
# pallas_call wrappers
# ----------------------------------------------------------------------------
def _row_spec(tile_n, cols):
    return pl.BlockSpec((tile_n, cols), lambda i: (i, 0))


def _full_spec(rows, cols):
    return pl.BlockSpec((rows, cols), lambda i: (0, 0))


def conv1x1a_bn_relu(x_bf, w1, b1, *, tile_n):
    n, cin = x_bf.shape
    cb = w1.shape[1]
    return pl.pallas_call(
        _conv1x1a_kernel,
        out_shape=jax.ShapeDtypeStruct((n, cb), jnp.float32),
        grid_spec=pltpu.PrefetchScalarGridSpec(
            num_scalar_prefetch=0,
            grid=(n // tile_n,),
            in_specs=[_row_spec(tile_n, cin),
                      _full_spec(cin, cb),
                      _full_spec(1, cb)],
            out_specs=_row_spec(tile_n, cb),
        ),
        compiler_params=pltpu.CompilerParams(dimension_semantics=("parallel",)),
    )(x_bf, w1, b1)


def tail_fused(conv1, neigh, x, wg, bg, tw, tb, *, tile_n, proj):
    n_pad, cb = conv1.shape
    cout = tw.shape[1]
    return pl.pallas_call(
        functools.partial(_tail_fused_kernel, proj=proj),
        out_shape=jax.ShapeDtypeStruct((n_pad, cout), jnp.float32),
        grid_spec=pltpu.PrefetchScalarGridSpec(
            num_scalar_prefetch=0,
            grid=(n_pad // tile_n,),
            in_specs=[
                _row_spec(tile_n, neigh.shape[1]),   # neighbor ids for this row tile
                _full_spec(n_pad, cb),               # conv1: fetched once, resident
                _row_spec(tile_n, x.shape[1]),       # x rows (bf16 proj / f32 identity)
                _full_spec(wg.shape[0], wg.shape[1]),
                _full_spec(1, cb),
                _full_spec(tw.shape[0], cout),
                _full_spec(1, cout),
            ],
            out_specs=_row_spec(tile_n, cout),
        ),
        compiler_params=pltpu.CompilerParams(dimension_semantics=("parallel",)),
    )(neigh, conv1, x, wg, bg, tw, tb)


def tail_pregathered(yg, x, wg, bg, tw, tb, *, tile_n, proj):
    n_pad, kcb = yg.shape
    cb = wg.shape[1]
    cout = tw.shape[1]
    return pl.pallas_call(
        functools.partial(_tail_pregathered_kernel, proj=proj),
        out_shape=jax.ShapeDtypeStruct((n_pad, cout), jnp.float32),
        grid_spec=pltpu.PrefetchScalarGridSpec(
            num_scalar_prefetch=0,
            grid=(n_pad // tile_n,),
            in_specs=[
                _row_spec(tile_n, kcb),
                _row_spec(tile_n, x.shape[1]),
                _full_spec(kcb, cb),
                _full_spec(1, cb),
                _full_spec(tw.shape[0], cout),
                _full_spec(1, cout),
            ],
            out_specs=_row_spec(tile_n, cout),
        ),
        compiler_params=pltpu.CompilerParams(dimension_semantics=("parallel",)),
    )(yg, x, wg, bg, tw, tb)


# ----------------------------------------------------------------------------
# Glue: BN folding, padding, forward pass
# ----------------------------------------------------------------------------
def _round_up(a, b):
    return ((a + b - 1) // b) * b


def fold_bn(w, gamma, beta, mean, var, eps=1e-5):
    """Fold BN scale into the (last-axis-output) weight; return bf16 W, f32 shift."""
    scale = gamma / jnp.sqrt(var + eps)
    w_f = (w * scale).astype(jnp.bfloat16)
    b_f = (beta - mean * scale)[None, :].astype(jnp.float32)
    return w_f, b_f


def gather_neighbors(feat, neigh):
    """XLA fallback gather: feat (N,C), neigh (N,K) int32 with -1 padding -> (N,K*C)."""
    n, c = feat.shape
    feat_z = jnp.concatenate([feat, jnp.zeros((1, c), feat.dtype)], axis=0)
    idx = jnp.where(neigh >= 0, neigh, n)
    return feat_z[idx].reshape(neigh.shape[0], -1)


def graph_res_block(params, x, neigh, *, tile_n=1024):
    """Forward pass of GraphResBlock (inference)."""
    n, cin = x.shape
    K, cb, _ = params["w_graph"].shape
    cout = params["w_1x1b"].shape[1]

    # Fold BN scales into bf16 weights; keep shifts in f32.
    w1, b1 = fold_bn(params["w_1x1a"], *params["bn_1x1a"])
    wg, bg = fold_bn(params["w_graph"], *params["bn_graph"])
    wg = wg.reshape(K * cb, cb)
    wb, bb = fold_bn(params["w_1x1b"], *params["bn_1x1b"])
    proj = "w_1x1c" in params
    if proj:
        wc, bc = fold_bn(params["w_1x1c"], *params["bn_1x1c"])
        tail_w = jnp.concatenate([wb, wc], axis=0)   # (cb+cin, cout) bf16, one matmul
        tail_b = bb + bc                              # folded bias
    else:
        tail_w, tail_b = wb, bb

    # Row tile: multiple of 16 (bf16 sublane packing), capped so the grid has >=2
    # steps when N allows (v7x's two TensorCores both get work), default 1024 rows
    # to amortize per-grid-step overhead for large N.  Per-step VMEM (row tiles +
    # resident weights + resident conv1) is far under the scoped default at these
    # widths; for very large N budget n_pad*cb*4 B for the resident conv1 (v7x has
    # half the VMEM of v5e/v6e) before raising vmem_limit_bytes.
    tn = min(tile_n, _round_up(max((n + 1) // 2, 16), 16))
    n_pad = _round_up(n, tn)
    x_f32 = jnp.pad(x, ((0, n_pad - n), (0, 0)))
    x_bf = x_f32.astype(jnp.bfloat16)
    neigh_p = jnp.pad(neigh, ((0, n_pad - n), (0, 0)), constant_values=-1)

    # Stage 1: conv1x1a + BN + ReLU.  conv1 stays f32 (gather-friendly dtype); it
    # is only Cb channels wide, ~9x less HBM traffic than the old (N, K*Cb) slab.
    conv1 = conv1x1a_bn_relu(x_bf, w1, b1, tile_n=tn)        # (n_pad, cb) f32

    # Stage 2: in-kernel neighbor gather + graph conv + BN + ReLU + conv1x1b+BN
    # (+ projection shortcut fused into the same matmul) + residual add + ReLU.
    x_short = x_bf if proj else x_f32
    try:
        out = tail_fused(conv1, neigh_p, x_short, wg, bg, tail_w, tail_b,
                         tile_n=tn, proj=proj)
    except Exception:
        # TODO(synk): fallback for jax/libtpu builds where the in-kernel row
        # gather (jnp.take on the VMEM-resident conv1 operand) does not lower;
        # this path re-materializes the (N, K*Cb) slab via an XLA gather.
        yg = gather_neighbors(conv1.astype(jnp.bfloat16), neigh_p)
        out = tail_pregathered(yg, x_short, wg, bg, tail_w, tail_b,
                               tile_n=tn, proj=proj)
    return out[:n]


# ----------------------------------------------------------------------------
# Parameter init + pure-JAX reference (same folded/bf16 numerics)
# ----------------------------------------------------------------------------
def init_params(key, in_channels, out_channels, bottleneck, K):
    cb = out_channels // bottleneck
    ks = jax.random.split(key, 8)

    def bn(k, c):
        k1, k2, k3, k4 = jax.random.split(k, 4)
        gamma = 1.0 + 0.1 * jax.random.uniform(k1, (c,), jnp.float32)
        beta = 0.05 * jax.random.normal(k2, (c,), jnp.float32)
        mean = 0.1 * jax.random.normal(k3, (c,), jnp.float32)
        var = 1.0 + 0.2 * jax.random.uniform(k4, (c,), jnp.float32)
        return gamma, beta, mean, var

    p = {
        "w_1x1a": 0.1 * jax.random.normal(ks[0], (in_channels, cb), jnp.float32),
        "bn_1x1a": bn(ks[1], cb),
        "w_graph": 0.1 * jax.random.normal(ks[2], (K, cb, cb), jnp.float32),
        "bn_graph": bn(ks[3], cb),
        "w_1x1b": 0.1 * jax.random.normal(ks[4], (cb, out_channels), jnp.float32),
        "bn_1x1b": bn(ks[5], out_channels),
    }
    if in_channels != out_channels:
        p["w_1x1c"] = 0.1 * jax.random.normal(
            ks[6], (in_channels, out_channels), jnp.float32)
        p["bn_1x1c"] = bn(ks[7], out_channels)
    return p


def reference_forward(params, x, neigh):
    K, cb, _ = params["w_graph"].shape
    w1, b1 = fold_bn(params["w_1x1a"], *params["bn_1x1a"])
    wg, bg = fold_bn(params["w_graph"], *params["bn_graph"])
    wg = wg.reshape(K * cb, cb)
    wb, bb = fold_bn(params["w_1x1b"], *params["bn_1x1b"])

    x_bf = x.astype(jnp.bfloat16)
    conv1 = jnp.maximum(
        jnp.dot(x_bf, w1, preferred_element_type=jnp.float32) + b1, 0.0)
    yg = gather_neighbors(conv1.astype(jnp.bfloat16), neigh)
    conv2 = jnp.maximum(
        jnp.dot(yg, wg, preferred_element_type=jnp.float32) + bg, 0.0
    ).astype(jnp.bfloat16)
    conv3 = jnp.dot(conv2, wb, preferred_element_type=jnp.float32) + bb
    if "w_1x1c" in params:
        wc, bc = fold_bn(params["w_1x1c"], *params["bn_1x1c"])
        short = jnp.dot(x_bf, wc, preferred_element_type=jnp.float32) + bc
    else:
        short = x
    return jnp.maximum(conv3 + short, 0.0)


# ----------------------------------------------------------------------------
if __name__ == "__main__":
    N = 64       # graph nodes at this depth
    K = 8        # neighbor slots per node, -1 padded
    bottleneck = 4

    key = jax.random.PRNGKey(0)
    kx1, kx2, kn, kp1, kp2 = jax.random.split(key, 5)
    neigh = jax.random.randint(kn, (N, K), -1, N, dtype=jnp.int32)

    # Case 1: projection shortcut (Cin != Cout).
    cin1, cout1 = 64, 128
    x1 = jax.random.normal(kx1, (N, cin1), jnp.float32)
    p1 = init_params(kp1, cin1, cout1, bottleneck, K)
    out1 = jax.block_until_ready(graph_res_block(p1, x1, neigh))
    ref1 = reference_forward(p1, x1, neigh)
    assert out1.shape == (N, cout1), out1.shape
    assert jnp.allclose(out1, ref1, rtol=1e-2, atol=1e-2), "proj branch mismatch"

    # Case 2: identity shortcut (Cin == Cout).
    cin2 = cout2 = 128
    x2 = jax.random.normal(kx2, (N, cin2), jnp.float32)
    p2 = init_params(kp2, cin2, cout2, bottleneck, K)
    out2 = jax.block_until_ready(graph_res_block(p2, x2, neigh))
    ref2 = reference_forward(p2, x2, neigh)
    assert out2.shape == (N, cout2), out2.shape
    assert jnp.allclose(out2, ref2, rtol=1e-2, atol=1e-2), "identity branch mismatch"

    print("KERNEL_OK")
</pallas_src>

<mosaic_0001>
module attributes {stable_mosaic.version = 11 : i64} {
  func.func @_conv1x1a_kernel(%arg0: i32, %arg1: memref<32x64xbf16, #tpu.memory_space<vmem>>, %arg2: memref<64x32xbf16, #tpu.memory_space<vmem>>, %arg3: memref<1x32xf32, #tpu.memory_space<vmem>>, %arg4: memref<32x32xf32, #tpu.memory_space<vmem>>) attributes {dimension_semantics = [#tpu.dimension_semantics<parallel>], iteration_bounds = array<i64: 2>, scalar_prefetch = 0 : i64, scratch_operands = 0 : i64, tpu.core_type = #tpu.core_type<tc>, window_params = [{transform_indices = @transform_0, window_bounds = array<i64: 32, 64>}, {pipeline_mode = #tpu.pipeline_mode<synchronous>, transform_indices = @transform_1, window_bounds = array<i64: 64, 32>}, {pipeline_mode = #tpu.pipeline_mode<synchronous>, transform_indices = @transform_2, window_bounds = array<i64: 1, 32>}, {transform_indices = @transform_3, window_bounds = array<i64: 32, 32>}]} {
    %c0 = arith.constant 0 : index
    %c0_0 = arith.constant 0 : index
    %0 = vector.load %arg1[%c0, %c0_0] : memref<32x64xbf16, #tpu.memory_space<vmem>>, vector<32x64xbf16>
    %c0_1 = arith.constant 0 : index
    %c0_2 = arith.constant 0 : index
    %1 = vector.load %arg2[%c0_1, %c0_2] : memref<64x32xbf16, #tpu.memory_space<vmem>>, vector<64x32xbf16>
    %cst = arith.constant dense<0.000000e+00> : vector<32x32xf32>
    %2 = tpu.matmul %0, %1, %cst {dimension_numbers = #tpu.dot_dimension_numbers<[1], [0], [0], [1], [0, 0, 1, 1], [], []>} : vector<32x64xbf16>, vector<64x32xbf16>, vector<32x32xf32> -> vector<32x32xf32>
    %c0_3 = arith.constant 0 : index
    %c0_4 = arith.constant 0 : index
    %3 = vector.load %arg3[%c0_3, %c0_4] : memref<1x32xf32, #tpu.memory_space<vmem>>, vector<1x32xf32>
    %4 = vector.broadcast %3 : vector<1x32xf32> to vector<32x32xf32>
    %5 = arith.addf %2, %4 : vector<32x32xf32>
    %cst_5 = arith.constant 0.000000e+00 : f32
    %6 = vector.broadcast %cst_5 : f32 to vector<32x32xf32>
    %7 = arith.maximumf %5, %6 : vector<32x32xf32>
    %c0_6 = arith.constant 0 : index
    %c0_7 = arith.constant 0 : index
    %8 = vector.load %arg4[%c0_6, %c0_7] : memref<32x32xf32, #tpu.memory_space<vmem>>, vector<32x32xf32>
    tpu.vector_store %arg4[%c0_6, %c0_7], %7 {strides = array<i32>} : memref<32x32xf32, #tpu.memory_space<vmem>>, vector<32x32xf32>,
    return
  }
  func.func @transform_0(%arg0: i32) -> (i32, i32) {
    %c0_i32 = arith.constant 0 : i32
    %c0_i32_0 = arith.constant 0 : i32
    return %arg0, %c0_i32 : i32, i32
  }
  func.func @transform_1(%arg0: i32) -> (i32, i32) {
    %c0_i32 = arith.constant 0 : i32
    %c0_i32_0 = arith.constant 0 : i32
    %c0_i32_1 = arith.constant 0 : i32
    return %c0_i32, %c0_i32_0 : i32, i32
  }
  func.func @transform_2(%arg0: i32) -> (i32, i32) {
    %c0_i32 = arith.constant 0 : i32
    %c0_i32_0 = arith.constant 0 : i32
    %c0_i32_1 = arith.constant 0 : i32
    return %c0_i32, %c0_i32_0 : i32, i32
  }
  func.func @transform_3(%arg0: i32) -> (i32, i32) {
    %c0_i32 = arith.constant 0 : i32
    %c0_i32_0 = arith.constant 0 : i32
    return %arg0, %c0_i32 : i32, i32
  }
}

</mosaic_0001>

<bundles_post_ra>
// kernel: tpu_custom_call.1
= control target key start
LH: loop header
LB: loop body
LE: loop exit
PB: predicated region body
PF: predicated region fallthrough
CT: control target
= control target key end

     0   :  { %s429_s12 = smov 0   ;;  %s461_s0 = inlined_call_operand.vmem [shape: bf16[64,64], index: 0, kind: input, shape index: {}]   ;;  %s462_s1 = inlined_call_operand.vmem [shape: bf16[64,32], index: 1, kind: input, shape index: {}]   ;;  %s463_s2 = inlined_call_operand.vmem [shape: f32[1,32], index: 2, kind: input, shape index: {}]   ;;  %s464_s3 = inlined_call_operand.vmem [shape: f32[64,32], index: 3, kind: output, shape index: {}]  }
   0x1 LB: > { %s349_s13 = sadd.s32 4294967295, %s407_s12   ;;  %p353_p0 = scmp.ge.s32.totalorder %s407_s12, 1  ;;  %s407_s12 = sphi %s429_s12, %s13_s12  }
   0x2   : > { %p138_p1 = scmp.lt.s32.totalorder %s407_s12, 3 }
   0x4   : > { %p139_p2 = pnand %p353_p0, %p138_p1 }
   0x5   : > { %s354_s16 = sshll.u32 (!%p139_p2), %s349_s13, 2 }
   0x6   : > { %142 = sbr.rel (%p139_p2) target bundleno = 232 (0xe8), region = 32  ;;  %p163_p3 = scmp.lt.s32.totalorder (!%p139_p2), %s354_s16, 7 }
   0xb   : > { %v395_v0 = vld [vmem:[%s462_s1 + $0x18] sm:$0xff]   ;;  %v396_v1 = vld [vmem:[%s462_s1 + $0x10] sm:$0xff]   ;;  %s466_s16 = smov (!%p163_p3, %s354_s16), 7  ;;  %v397_v2 = vld [vmem:[%s462_s1 + $0x8] sm:$0xff]   ;;  %vm228_vm0 = vcmask 523264   ;;  %vm288_vm1 = vcmask 261120  }
   0xc   : > { %375 = vmatprep.subr.bf16.mxu0 %v395_v0  ;;  %s355_s21 = sshll.u32 %s466_s16, 2  ;;  %v398_v4 = vld [vmem:[%s462_s1] sm:$0xff]   ;;  %s357_s27 = sshll.u32 %s466_s16, 3 }
   0xd   : > { %376 = vmatpush3.bf16.msra.mxu0 %v395_v0  ;;  %s166_s24 = scalar_lea.vmem %s461_s0, %s355_s21  ;;  %v358_v7 = vld [vmem:[%s463_s2] ss:$0 sm:$0xff]  ;;  %s172_s5 = scalar_lea.vmem %s464_s3, %s357_s27 }
   0xe   : > { %377 = vmatprep.subr.bf16.mxu0 %v396_v1  ;;  %v399_v3 = vld [vmem:[%s166_s24] sm:$0xff]   ;;  %v400_v5 = vld [vmem:[%s166_s24 + $0x8] sm:$0xff]  }
   0xf   : > { %383 = vmatprep.mubr.msk.bf16.mxu0 %vm228_vm0, %v399_v3 }
  0x11   : > { %378 = vmatpush3.bf16.msra.mxu0 %v396_v1 }
  0x12   : > { %379 = vmatprep.subr.bf16.mxu0 %v397_v2 }
  0x15   : > { %380 = vmatpush3.bf16.msra.mxu0 %v397_v2 }
  0x16   : > { %381 = vmatprep.subr.bf16.mxu0 %v398_v4 }
  0x19   : > { %382 = vmatpush3.bf16.msra.mxu0 %v398_v4 }
  0x1c   : > { %384 = vmatmul.mubr.msk.bf16.vlgmr.msra.gmra.mxu0 %vm228_vm0, %v400_v5 }
  0xdc   : > { %v385_v6 = vpop.f32.mrf.mxu0 }
  0xdd   : > { %v278_v12 = vadd.f32 %v385_v6, %v358_v7 }
  0xde   : > { %v269_v8 = vpop.f32.mrf.mxu0 }
  0xdf   : > { %v270_v9 = vadd.f32 %v358_v7, %v269_v8  ;;  %v286_v17 = vmax.f32 %v278_v12, 0.0 }
  0xe0   : > { %v386_v10 = vpop.f32.mrf.mxu0 }
  0xe1   : > { %v284_v11 = vmax.f32 %v270_v9, 0.0  ;;  %v281_v14 = vadd.f32 %v386_v10, %v358_v7  ;;  %291 = vst.msk [vmem:[%s172_s5 + $0x10] sm:$0xff] %vm288_vm1, %v286_v17 }
  0xe2   : > { %v272_v13 = vpop.f32.mrf.mxu0 }
  0xe3   : > { %289 = vst.msk [vmem:[%s172_s5] sm:$0xff] %vm288_vm1, %v284_v11  ;;  %v273_v15 = vadd.f32 %v358_v7, %v272_v13  ;;  %v287_v18 = vmax.f32 %v281_v14, 0.0 }
  0xe5   : > { %v285_v16 = vmax.f32 %v273_v15, 0.0  ;;  %292 = vst.msk [vmem:[%s172_s5 + $0x18] sm:$0xff] %vm288_vm1, %v287_v18 }
  0xe7   : > { %290 = vst.msk [vmem:[%s172_s5 + $0x8] sm:$0xff] %vm288_vm1, %v285_v16 }
  0xe8 PF: > { %s13_s12 = sadd.s32 1, %s407_s12  }
  0xe9   : > { %p10_p4 = scmp.ge.s32.totalorder %s13_s12, 4  }
  0xeb   :  { %12 = sbr.rel (!%p10_p4) target bundleno = 1 (0x1), region = 62 }

</bundles_post_ra>
